<compile_context>
chip_gen: v6e
topology: v6e:2x2x1
jax: 0.10.0
libtpu: 0.0.40
codegen_flags: <defaults>
</compile_context>

<pallas_src>
import numpy as np
import jax
import jax.numpy as jnp
from jax.experimental import pallas as pl
from jax.experimental.pallas import tpu as pltpu


def _ru8(x):
    return ((x + 7) // 8) * 8


# ----------------------------------------------------------------------------
# In-kernel building blocks.  Internal layout: values are (C, N*L) f32 with
# channels on sublanes and the flattened (batch, length) index on lanes
# (per-batch blocks of L consecutive lanes).
# ----------------------------------------------------------------------------
def _unpool(x, ind, q):
    """MaxUnpool1d(kernel=2, stride=2).

    Exact for MaxPool1d(2,2) indices: ind[., m] in {2m, 2m+1} per (n, c).
    x, ind: (C, R);  q: (2R, 2R) constant scatter matrix  ->  (C, 2R).
    """
    parity = (ind & 1).astype(jnp.float32)     # 1 where the max sat at 2m+1
    odd = x * parity
    even = x - odd
    cat = jnp.concatenate([even, odd], axis=1)                     # (C, 2R)
    return jnp.dot(cat, q, preferred_element_type=jnp.float32)     # (C, 2R)


def _convtr_bn_relu(u, w_row, bias, gamma, beta, l, eps=1e-5):
    """ConvTranspose1d(K=3, stride=1, padding=1) + BatchNorm1d + ReLU.

    u:     (Cin, R) with R = N*l (per-batch blocks of l lanes)
    w_row: (Cout, 3*Cin) pre-folded weight, columns ordered [tap0|tap1|tap2]
           with taps flipped (tap t multiplies u shifted by t-1).
    bias/gamma/beta: (Cout, 1).
    """
    cin, r = u.shape
    col = jax.lax.broadcasted_iota(jnp.int32, (cin, r), 1)
    lm = (col & (l - 1)) if (l & (l - 1)) == 0 else (col % l)
    zc = jnp.zeros((cin, 1), jnp.float32)
    prev = jnp.concatenate([zc, u[:, :r - 1]], axis=1)   # u[:, j-1]
    nxt = jnp.concatenate([u[:, 1:], zc], axis=1)        # u[:, j+1]
    prev = jnp.where(lm == 0, 0.0, prev)                 # zero-pad per batch
    nxt = jnp.where(lm == l - 1, 0.0, nxt)
    xk = jnp.concatenate([prev, u, nxt], axis=0)         # (3*Cin, R)
    y = jnp.dot(w_row, xk, preferred_element_type=jnp.float32) + bias

    # Training-mode BatchNorm1d (biased batch variance over N and L) + ReLU.
    inv = 1.0 / r
    mean = jnp.sum(y, axis=1, keepdims=True) * inv
    d = y - mean
    var = jnp.sum(d * d, axis=1, keepdims=True) * inv
    out = d * jax.lax.rsqrt(var + eps) * gamma + beta
    return jnp.maximum(out, 0.0)


# ----------------------------------------------------------------------------
# Fused kernel: unpool -> convT+BN+ReLU -> unpool -> convT+BN+ReLU
# ----------------------------------------------------------------------------
def _make_kernel(c1, c2, kcols1, kcols2, row2):
    def kernel(x_ref, i1_ref, i2_ref, q_ref, p_ref, o_ref):
        n, _, l0 = x_ref.shape
        r0 = n * l0
        l1, l2 = 2 * l0, 4 * l0

        # NCL -> (C, N*L): per-batch (C, L) blocks concatenated along lanes
        # (no transposes anywhere).
        x = jnp.concatenate([x_ref[b] for b in range(n)], axis=1)
        i1 = jnp.concatenate([i1_ref[b] for b in range(n)], axis=1)
        i2 = jnp.concatenate([i2_ref[b] for b in range(n)], axis=1)

        # Packed parameters (all static, 8-aligned row offsets).
        w1 = p_ref[0:c1, 0:kcols1]
        b1 = p_ref[0:c1, kcols1:kcols1 + 1]
        g1 = p_ref[0:c1, kcols1 + 1:kcols1 + 2]
        be1 = p_ref[0:c1, kcols1 + 2:kcols1 + 3]
        w2 = p_ref[row2:row2 + c2, 0:kcols2]
        b2 = p_ref[row2:row2 + c2, kcols2:kcols2 + 1]
        g2 = p_ref[row2:row2 + c2, kcols2 + 1:kcols2 + 2]
        be2 = p_ref[row2:row2 + c2, kcols2 + 2:kcols2 + 3]

        # Precomputed unpool scatter matrices.
        q2_off = _ru8(2 * r0)
        q1 = q_ref[0:2 * r0, 0:2 * r0]
        q2 = q_ref[q2_off:q2_off + 4 * r0, 0:4 * r0]

        h = _unpool(x, i1, q1)                           # (c0, 2*r0)
        h = _convtr_bn_relu(h, w1, b1, g1, be1, l1)      # (c1, 2*r0)
        h = _unpool(h, i2, q2)                           # (c1, 4*r0)
        h = _convtr_bn_relu(h, w2, b2, g2, be2, l2)      # (c2, 4*r0)

        # (C_out, N*L_out) -> (N*C_out, L_out) rows == NCL flattened over N,C.
        for b in range(n):
            o_ref[b * c2:(b + 1) * c2, :] = h[:, b * l2:(b + 1) * l2]

    return kernel


# ----------------------------------------------------------------------------
# Host-side packing helpers (run once at init / first trace).
# ----------------------------------------------------------------------------
def _fold_convtr_weight(w_pt):
    """PyTorch ConvTranspose1d weight (Cin, Cout, K) -> (Cout, K*Cin).

    Columns ordered [tap0 | tap1 | tap2] with taps flipped so the transpose
    conv becomes a plain correlation on the (implicitly zero-padded) input.
    """
    cin, cout, k = w_pt.shape
    w_flip = jnp.transpose(w_pt, (2, 0, 1))[::-1]     # (K, Cin, Cout) flipped
    return w_flip.reshape(k * cin, cout).T            # (Cout, K*Cin)


def _pack_params(w1_row, b1, g1, be1, w2_row, b2, g2, be2):
    """Pack all conv/BN parameters into one lane-padded f32 slab."""
    def block(wrow, b, g, be):
        return jnp.concatenate(
            [wrow, b[:, None], g[:, None], be[:, None]], axis=1)
    bl1 = block(w1_row, b1, g1, be1)          # (c1, 3*c0 + 3)
    bl2 = block(w2_row, b2, g2, be2)          # (c2, 3*c1 + 3)
    width = _ru8(max(bl1.shape[1], bl2.shape[1]))
    row2 = _ru8(bl1.shape[0])
    rows = row2 + _ru8(bl2.shape[0])

    def pad(a, r, w):
        return jnp.pad(a, ((0, r - a.shape[0]), (0, w - a.shape[1])))

    packed = jnp.concatenate(
        [pad(bl1, row2, width), pad(bl2, rows - row2, width)], axis=0)
    meta = dict(c1=w1_row.shape[0], c2=w2_row.shape[0],
                kcols1=w1_row.shape[1], kcols2=w2_row.shape[1], row2=row2)
    return packed, meta


def _build_qpack_np(r0):
    """Stack the two unpool scatter matrices into one numpy constant.

    q[i, j] = 1 iff output column j receives source column i, where the first
    R rows are the even-parity sources (j = 2i) and the next R rows the odd
    ones (j = 2i + 1).  Built once at trace time (shape-static), DMA'd as a
    constant operand.
    """
    def q(r):
        m = np.zeros((2 * r, 2 * r), np.float32)
        ar = np.arange(r)
        m[ar, 2 * ar] = 1.0
        m[r + ar, 2 * ar + 1] = 1.0
        return m

    q1, q2 = q(r0), q(2 * r0)
    off = _ru8(2 * r0)
    out = np.zeros((off + 4 * r0, max(4 * r0, 2 * r0)), np.float32)
    out[:2 * r0, :2 * r0] = q1
    out[off:off + 4 * r0, :4 * r0] = q2
    return out


def _make_forward(meta):
    kernel = _make_kernel(**meta)
    c2 = meta["c2"]

    @jax.jit
    def fwd(x_ncl, ind1_ncl, ind2_ncl, params):
        n, _, l0 = x_ncl.shape
        r0 = n * l0
        l_out = 4 * l0
        qpack = jnp.asarray(_build_qpack_np(r0))   # trace-time constant
        out = pl.pallas_call(
            kernel,
            out_shape=jax.ShapeDtypeStruct((n * c2, l_out), jnp.float32),
            in_specs=[pl.BlockSpec(memory_space=pltpu.MemorySpace.VMEM)] * 5,
            out_specs=pl.BlockSpec(memory_space=pltpu.MemorySpace.VMEM),
        )(x_ncl.astype(jnp.float32), ind1_ncl.astype(jnp.int32),
          ind2_ncl.astype(jnp.int32), qpack, params)
        return out.reshape(n, c2, l_out)           # free contiguous reshape

    return fwd


# ----------------------------------------------------------------------------
# X_Dec equivalent
# ----------------------------------------------------------------------------
class XDecPallas:
    def __init__(self, key):
        k1, k2 = jax.random.split(key)
        # kaiming_normal_(mode='fan_out', relu) on weight (Cin, Cout, K):
        # fan_out = Cin * K  =>  std = sqrt(2 / (Cin * K)).
        std = (2.0 / (8 * 3)) ** 0.5
        self.w1 = jax.random.normal(k1, (8, 8, 3), jnp.float32) * std
        self.b1 = jnp.zeros((8,), jnp.float32)
        self.g1 = jnp.ones((8,), jnp.float32)
        self.be1 = jnp.zeros((8,), jnp.float32)
        self.w2 = jax.random.normal(k2, (8, 4, 3), jnp.float32) * std
        self.b2 = jnp.zeros((4,), jnp.float32)
        self.g2 = jnp.ones((4,), jnp.float32)
        self.be2 = jnp.zeros((4,), jnp.float32)

        # Kernel-ready packed parameters (built once, outside the hot path).
        w1_row = _fold_convtr_weight(self.w1)      # (8, 24)
        w2_row = _fold_convtr_weight(self.w2)      # (4, 24)
        self.params, meta = _pack_params(w1_row, self.b1, self.g1, self.be1,
                                         w2_row, self.b2, self.g2, self.be2)
        self._fwd = _make_forward(meta)

    def __call__(self, x_ncl, all_maxpools):
        # X_Dec.forward: MaxUnpool layers consume all_maxpools[ct], ct=-1,-2,...
        return self._fwd(x_ncl, all_maxpools[-1], all_maxpools[-2], self.params)


# ----------------------------------------------------------------------------
# Independent pure-JAX reference (NCL, loop/scatter based)
# ----------------------------------------------------------------------------
def _ref_forward(x, all_maxpools, m):
    def unpool(x, ind):
        N, C, L = x.shape
        out = jnp.zeros((N, C, 2 * L), jnp.float32)
        n_i = jnp.arange(N)[:, None, None]
        c_i = jnp.arange(C)[None, :, None]
        return out.at[n_i, c_i, ind].set(x)

    def convtr(x, w, b, padding=1):
        N, Cin, L = x.shape
        _, Cout, K = w.shape
        Lout = (L - 1) - 2 * padding + K
        out = jnp.zeros((N, Cout, Lout), jnp.float32)
        for li in range(L):
            for k in range(K):
                lo = li - padding + k
                if 0 <= lo < Lout:
                    out = out.at[:, :, lo].add(x[:, :, li] @ w[:, :, k])
        return out + b[None, :, None]

    def bnrelu(x, g, be):
        mu = x.mean(axis=(0, 2), keepdims=True)
        v = ((x - mu) ** 2).mean(axis=(0, 2), keepdims=True)
        y = (x - mu) / jnp.sqrt(v + 1e-5) * g[None, :, None] + be[None, :, None]
        return jnp.maximum(y, 0.0)

    x = x.astype(jnp.float32)
    x = unpool(x, all_maxpools[-1])
    x = convtr(x, m.w1, m.b1)
    x = bnrelu(x, m.g1, m.be1)
    x = unpool(x, all_maxpools[-2])
    x = convtr(x, m.w2, m.b2)
    x = bnrelu(x, m.g2, m.be2)
    return x


# ----------------------------------------------------------------------------
if __name__ == "__main__":
    key = jax.random.PRNGKey(0)
    k_x, k_p, k_i1, k_i2 = jax.random.split(key, 4)

    N, C, L = 2, 8, 4  # decoder input: coarsest feature map, NCL
    x = jax.random.normal(k_x, (N, C, L), jnp.float32)

    # Synthetic MaxPool1d(2,2) indices: window l picks element 2l or 2l+1.
    def make_indices(k, n, c, lp):
        bits = jax.random.bernoulli(k, 0.5, (n, c, lp)).astype(jnp.int32)
        return 2 * jnp.arange(lp, dtype=jnp.int32)[None, None, :] + bits

    ind_fine = make_indices(k_i1, N, C, 8)    # for output length 16
    ind_coarse = make_indices(k_i2, N, C, 4)  # for output length 8
    all_maxpools = [ind_fine, ind_coarse]     # encoder order: fine ... coarse

    model = XDecPallas(k_p)
    out = model(x, all_maxpools)
    out = jax.block_until_ready(out)

    ref = _ref_forward(x, all_maxpools, model)
    assert out.shape == (N, 4, 16), out.shape
    assert jnp.allclose(out, ref, atol=1e-4, rtol=1e-4), (
        float(jnp.max(jnp.abs(out - ref)))
    )
    print("KERNEL_OK")
</pallas_src>

<mosaic_0001>
module attributes {stable_mosaic.version = 11 : i64} {
  func.func @kernel(%arg0: memref<2x8x4xf32, #tpu.memory_space<vmem>>, %arg1: memref<2x8x4xi32, #tpu.memory_space<vmem>>, %arg2: memref<2x8x8xi32, #tpu.memory_space<vmem>>, %arg3: memref<48x32xf32, #tpu.memory_space<vmem>>, %arg4: memref<16x32xf32, #tpu.memory_space<vmem>>, %arg5: memref<8x16xf32, #tpu.memory_space<vmem>>) attributes {dimension_semantics = [], scalar_prefetch = 0 : i64, scratch_operands = 0 : i64, tpu.core_type = #tpu.core_type<tc>} {
    %c0 = arith.constant 0 : index
    %c0_0 = arith.constant 0 : index
    %c0_1 = arith.constant 0 : index
    %0 = vector.load %arg0[%c0, %c0_0, %c0_1] : memref<2x8x4xf32, #tpu.memory_space<vmem>>, vector<1x8x4xf32>
    %1 = vector.shape_cast %0 : vector<1x8x4xf32> to vector<8x4xf32>
    %c1 = arith.constant 1 : index
    %c0_2 = arith.constant 0 : index
    %c0_3 = arith.constant 0 : index
    %2 = vector.load %arg0[%c1, %c0_2, %c0_3] : memref<2x8x4xf32, #tpu.memory_space<vmem>>, vector<1x8x4xf32>
    %3 = vector.shape_cast %2 : vector<1x8x4xf32> to vector<8x4xf32>
    %4 = tpu.concatenate %1, %3 in 1 : vector<8x4xf32>, vector<8x4xf32> -> vector<8x8xf32>
    %c0_4 = arith.constant 0 : index
    %c0_5 = arith.constant 0 : index
    %c0_6 = arith.constant 0 : index
    %5 = vector.load %arg1[%c0_4, %c0_5, %c0_6] : memref<2x8x4xi32, #tpu.memory_space<vmem>>, vector<1x8x4xi32>
    %6 = vector.shape_cast %5 : vector<1x8x4xi32> to vector<8x4xi32>
    %c1_7 = arith.constant 1 : index
    %c0_8 = arith.constant 0 : index
    %c0_9 = arith.constant 0 : index
    %7 = vector.load %arg1[%c1_7, %c0_8, %c0_9] : memref<2x8x4xi32, #tpu.memory_space<vmem>>, vector<1x8x4xi32>
    %8 = vector.shape_cast %7 : vector<1x8x4xi32> to vector<8x4xi32>
    %9 = tpu.concatenate %6, %8 in 1 : vector<8x4xi32>, vector<8x4xi32> -> vector<8x8xi32>
    %c0_10 = arith.constant 0 : index
    %c0_11 = arith.constant 0 : index
    %c0_12 = arith.constant 0 : index
    %10 = vector.load %arg2[%c0_10, %c0_11, %c0_12] : memref<2x8x8xi32, #tpu.memory_space<vmem>>, vector<1x8x8xi32>
    %11 = vector.shape_cast %10 : vector<1x8x8xi32> to vector<8x8xi32>
    %c1_13 = arith.constant 1 : index
    %c0_14 = arith.constant 0 : index
    %c0_15 = arith.constant 0 : index
    %12 = vector.load %arg2[%c1_13, %c0_14, %c0_15] : memref<2x8x8xi32, #tpu.memory_space<vmem>>, vector<1x8x8xi32>
    %13 = vector.shape_cast %12 : vector<1x8x8xi32> to vector<8x8xi32>
    %14 = tpu.concatenate %11, %13 in 1 : vector<8x8xi32>, vector<8x8xi32> -> vector<8x16xi32>
    %c0_16 = arith.constant 0 : index
    %c0_17 = arith.constant 0 : index
    %15 = vector.load %arg4[%c0_16, %c0_17] : memref<16x32xf32, #tpu.memory_space<vmem>>, vector<8x24xf32>
    %c0_18 = arith.constant 0 : index
    %c24 = arith.constant 24 : index
    %16 = vector.load %arg4[%c0_18, %c24] : memref<16x32xf32, #tpu.memory_space<vmem>>, vector<8x1xf32>
    %c0_19 = arith.constant 0 : index
    %c25 = arith.constant 25 : index
    %17 = vector.load %arg4[%c0_19, %c25] : memref<16x32xf32, #tpu.memory_space<vmem>>, vector<8x1xf32>
    %c0_20 = arith.constant 0 : index
    %c26 = arith.constant 26 : index
    %18 = vector.load %arg4[%c0_20, %c26] : memref<16x32xf32, #tpu.memory_space<vmem>>, vector<8x1xf32>
    %c8 = arith.constant 8 : index
    %c0_21 = arith.constant 0 : index
    %19 = vector.load %arg4[%c8, %c0_21] : memref<16x32xf32, #tpu.memory_space<vmem>>, vector<4x24xf32>
    %c8_22 = arith.constant 8 : index
    %c24_23 = arith.constant 24 : index
    %20 = vector.load %arg4[%c8_22, %c24_23] : memref<16x32xf32, #tpu.memory_space<vmem>>, vector<4x1xf32>
    %c8_24 = arith.constant 8 : index
    %c25_25 = arith.constant 25 : index
    %21 = vector.load %arg4[%c8_24, %c25_25] : memref<16x32xf32, #tpu.memory_space<vmem>>, vector<4x1xf32>
    %c8_26 = arith.constant 8 : index
    %c26_27 = arith.constant 26 : index
    %22 = vector.load %arg4[%c8_26, %c26_27] : memref<16x32xf32, #tpu.memory_space<vmem>>, vector<4x1xf32>
    %c0_28 = arith.constant 0 : index
    %c0_29 = arith.constant 0 : index
    %23 = vector.load %arg3[%c0_28, %c0_29] : memref<48x32xf32, #tpu.memory_space<vmem>>, vector<16x16xf32>
    %c16 = arith.constant 16 : index
    %c0_30 = arith.constant 0 : index
    %24 = vector.load %arg3[%c16, %c0_30] : memref<48x32xf32, #tpu.memory_space<vmem>>, vector<32x32xf32>
    %c1_i32 = arith.constant 1 : i32
    %25 = vector.broadcast %c1_i32 : i32 to vector<8x8xi32>
    %26 = arith.andi %9, %25 : vector<8x8xi32>
    %27 = arith.sitofp %26 : vector<8x8xi32> to vector<8x8xf32>
    %28 = arith.mulf %4, %27 : vector<8x8xf32>
    %29 = arith.subf %4, %28 : vector<8x8xf32>
    %30 = tpu.concatenate %29, %28 in 1 : vector<8x8xf32>, vector<8x8xf32> -> vector<8x16xf32>
    %cst = arith.constant dense<0.000000e+00> : vector<8x16xf32>
    %31 = tpu.matmul %30, %23, %cst {dimension_numbers = #tpu.dot_dimension_numbers<[1], [0], [0], [1], [0, 0, 1, 1], [], []>} : vector<8x16xf32>, vector<16x16xf32>, vector<8x16xf32> -> vector<8x16xf32>
    %32 = tpu.iota {dimensions = array<i32: 1>} : vector<8x16xi32>
    %c7_i32 = arith.constant 7 : i32
    %33 = vector.broadcast %c7_i32 : i32 to vector<8x16xi32>
    %34 = arith.andi %32, %33 : vector<8x16xi32>
    %cst_31 = arith.constant 0.000000e+00 : f32
    %35 = vector.broadcast %cst_31 : f32 to vector<8x1xf32>
    %36 = vector.extract_strided_slice %31 {offsets = [0, 0], sizes = [8, 15], strides = [1, 1]} : vector<8x16xf32> to vector<8x15xf32>
    %37 = tpu.concatenate %35, %36 in 1 : vector<8x1xf32>, vector<8x15xf32> -> vector<8x16xf32>
    %38 = vector.extract_strided_slice %31 {offsets = [0, 1], sizes = [8, 15], strides = [1, 1]} : vector<8x16xf32> to vector<8x15xf32>
    %39 = tpu.concatenate %38, %35 in 1 : vector<8x15xf32>, vector<8x1xf32> -> vector<8x16xf32>
    %c0_i32 = arith.constant 0 : i32
    %40 = vector.broadcast %c0_i32 : i32 to vector<8x16xi32>
    %41 = arith.cmpi eq, %34, %40 : vector<8x16xi32>
    %cst_32 = arith.constant 0.000000e+00 : f32
    %42 = vector.broadcast %cst_32 : f32 to vector<8x16xf32>
    %43 = arith.select %41, %42, %37 : vector<8x16xi1>, vector<8x16xf32>
    %c7_i32_33 = arith.constant 7 : i32
    %44 = vector.broadcast %c7_i32_33 : i32 to vector<8x16xi32>
    %45 = arith.cmpi eq, %34, %44 : vector<8x16xi32>
    %cst_34 = arith.constant 0.000000e+00 : f32
    %46 = vector.broadcast %cst_34 : f32 to vector<8x16xf32>
    %47 = arith.select %45, %46, %39 : vector<8x16xi1>, vector<8x16xf32>
    %48 = tpu.concatenate %43, %31, %47 in 0 : vector<8x16xf32>, vector<8x16xf32>, vector<8x16xf32> -> vector<24x16xf32>
    %cst_35 = arith.constant dense<0.000000e+00> : vector<8x16xf32>
    %49 = tpu.matmul %15, %48, %cst_35 {dimension_numbers = #tpu.dot_dimension_numbers<[1], [0], [0], [1], [0, 0, 1, 1], [], []>} : vector<8x24xf32>, vector<24x16xf32>, vector<8x16xf32> -> vector<8x16xf32>
    %50 = vector.broadcast %16 : vector<8x1xf32> to vector<8x16xf32>
    %51 = arith.addf %49, %50 : vector<8x16xf32>
    %cst_36 = arith.constant dense<0.000000e+00> : vector<8xf32>
    %52 = vector.multi_reduction <add>, %51, %cst_36 [1] : vector<8x16xf32> to vector<8xf32>
    %53 = vector.shape_cast %52 : vector<8xf32> to vector<8x1xf32>
    %cst_37 = arith.constant 6.250000e-02 : f32
    %54 = vector.broadcast %cst_37 : f32 to vector<8x1xf32>
    %55 = arith.mulf %53, %54 : vector<8x1xf32>
    %56 = vector.broadcast %55 : vector<8x1xf32> to vector<8x16xf32>
    %57 = arith.subf %51, %56 : vector<8x16xf32>
    %58 = arith.mulf %57, %57 : vector<8x16xf32>
    %cst_38 = arith.constant dense<0.000000e+00> : vector<8xf32>
    %59 = vector.multi_reduction <add>, %58, %cst_38 [1] : vector<8x16xf32> to vector<8xf32>
    %60 = vector.shape_cast %59 : vector<8xf32> to vector<8x1xf32>
    %cst_39 = arith.constant 6.250000e-02 : f32
    %61 = vector.broadcast %cst_39 : f32 to vector<8x1xf32>
    %62 = arith.mulf %60, %61 : vector<8x1xf32>
    %cst_40 = arith.constant 9.99999974E-6 : f32
    %63 = vector.broadcast %cst_40 : f32 to vector<8x1xf32>
    %64 = arith.addf %62, %63 : vector<8x1xf32>
    %65 = math.rsqrt %64 : vector<8x1xf32>
    %66 = vector.broadcast %65 : vector<8x1xf32> to vector<8x16xf32>
    %67 = arith.mulf %57, %66 : vector<8x16xf32>
    %68 = vector.broadcast %17 : vector<8x1xf32> to vector<8x16xf32>
    %69 = arith.mulf %67, %68 : vector<8x16xf32>
    %70 = vector.broadcast %18 : vector<8x1xf32> to vector<8x16xf32>
    %71 = arith.addf %69, %70 : vector<8x16xf32>
    %cst_41 = arith.constant 0.000000e+00 : f32
    %72 = vector.broadcast %cst_41 : f32 to vector<8x16xf32>
    %73 = arith.maximumf %71, %72 : vector<8x16xf32>
    %c1_i32_42 = arith.constant 1 : i32
    %74 = vector.broadcast %c1_i32_42 : i32 to vector<8x16xi32>
    %75 = arith.andi %14, %74 : vector<8x16xi32>
    %76 = arith.sitofp %75 : vector<8x16xi32> to vector<8x16xf32>
    %77 = arith.mulf %73, %76 : vector<8x16xf32>
    %78 = arith.subf %73, %77 : vector<8x16xf32>
    %79 = tpu.concatenate %78, %77 in 1 : vector<8x16xf32>, vector<8x16xf32> -> vector<8x32xf32>
    %cst_43 = arith.constant dense<0.000000e+00> : vector<8x32xf32>
    %80 = tpu.matmul %79, %24, %cst_43 {dimension_numbers = #tpu.dot_dimension_numbers<[1], [0], [0], [1], [0, 0, 1, 1], [], []>} : vector<8x32xf32>, vector<32x32xf32>, vector<8x32xf32> -> vector<8x32xf32>
    %81 = tpu.iota {dimensions = array<i32: 1>} : vector<8x32xi32>
    %c15_i32 = arith.constant 15 : i32
    %82 = vector.broadcast %c15_i32 : i32 to vector<8x32xi32>
    %83 = arith.andi %81, %82 : vector<8x32xi32>
    %cst_44 = arith.constant 0.000000e+00 : f32
    %84 = vector.broadcast %cst_44 : f32 to vector<8x1xf32>
    %85 = vector.extract_strided_slice %80 {offsets = [0, 0], sizes = [8, 31], strides = [1, 1]} : vector<8x32xf32> to vector<8x31xf32>
    %86 = tpu.concatenate %84, %85 in 1 : vector<8x1xf32>, vector<8x31xf32> -> vector<8x32xf32>
    %87 = vector.extract_strided_slice %80 {offsets = [0, 1], sizes = [8, 31], strides = [1, 1]} : vector<8x32xf32> to vector<8x31xf32>
    %88 = tpu.concatenate %87, %84 in 1 : vector<8x31xf32>, vector<8x1xf32> -> vector<8x32xf32>
    %c0_i32_45 = arith.constant 0 : i32
    %89 = vector.broadcast %c0_i32_45 : i32 to vector<8x32xi32>
    %90 = arith.cmpi eq, %83, %89 : vector<8x32xi32>
    %cst_46 = arith.constant 0.000000e+00 : f32
    %91 = vector.broadcast %cst_46 : f32 to vector<8x32xf32>
    %92 = arith.select %90, %91, %86 : vector<8x32xi1>, vector<8x32xf32>
    %c15_i32_47 = arith.constant 15 : i32
    %93 = vector.broadcast %c15_i32_47 : i32 to vector<8x32xi32>
    %94 = arith.cmpi eq, %83, %93 : vector<8x32xi32>
    %cst_48 = arith.constant 0.000000e+00 : f32
    %95 = vector.broadcast %cst_48 : f32 to vector<8x32xf32>
    %96 = arith.select %94, %95, %88 : vector<8x32xi1>, vector<8x32xf32>
    %97 = tpu.concatenate %92, %80, %96 in 0 : vector<8x32xf32>, vector<8x32xf32>, vector<8x32xf32> -> vector<24x32xf32>
    %cst_49 = arith.constant dense<0.000000e+00> : vector<4x32xf32>
    %98 = tpu.matmul %19, %97, %cst_49 {dimension_numbers = #tpu.dot_dimension_numbers<[1], [0], [0], [1], [0, 0, 1, 1], [], []>} : vector<4x24xf32>, vector<24x32xf32>, vector<4x32xf32> -> vector<4x32xf32>
    %99 = vector.broadcast %20 : vector<4x1xf32> to vector<4x32xf32>
    %100 = arith.addf %98, %99 : vector<4x32xf32>
    %cst_50 = arith.constant dense<0.000000e+00> : vector<4xf32>
    %101 = vector.multi_reduction <add>, %100, %cst_50 [1] : vector<4x32xf32> to vector<4xf32>
    %102 = vector.shape_cast %101 : vector<4xf32> to vector<4x1xf32>
    %cst_51 = arith.constant 3.125000e-02 : f32
    %103 = vector.broadcast %cst_51 : f32 to vector<4x1xf32>
    %104 = arith.mulf %102, %103 : vector<4x1xf32>
    %105 = vector.broadcast %104 : vector<4x1xf32> to vector<4x32xf32>
    %106 = arith.subf %100, %105 : vector<4x32xf32>
    %107 = arith.mulf %106, %106 : vector<4x32xf32>
    %cst_52 = arith.constant dense<0.000000e+00> : vector<4xf32>
    %108 = vector.multi_reduction <add>, %107, %cst_52 [1] : vector<4x32xf32> to vector<4xf32>
    %109 = vector.shape_cast %108 : vector<4xf32> to vector<4x1xf32>
    %cst_53 = arith.constant 3.125000e-02 : f32
    %110 = vector.broadcast %cst_53 : f32 to vector<4x1xf32>
    %111 = arith.mulf %109, %110 : vector<4x1xf32>
    %cst_54 = arith.constant 9.99999974E-6 : f32
    %112 = vector.broadcast %cst_54 : f32 to vector<4x1xf32>
    %113 = arith.addf %111, %112 : vector<4x1xf32>
    %114 = math.rsqrt %113 : vector<4x1xf32>
    %115 = vector.broadcast %114 : vector<4x1xf32> to vector<4x32xf32>
    %116 = arith.mulf %106, %115 : vector<4x32xf32>
    %117 = vector.broadcast %21 : vector<4x1xf32> to vector<4x32xf32>
    %118 = arith.mulf %116, %117 : vector<4x32xf32>
    %119 = vector.broadcast %22 : vector<4x1xf32> to vector<4x32xf32>
    %120 = arith.addf %118, %119 : vector<4x32xf32>
    %cst_55 = arith.constant 0.000000e+00 : f32
    %121 = vector.broadcast %cst_55 : f32 to vector<4x32xf32>
    %122 = arith.maximumf %120, %121 : vector<4x32xf32>
    %123 = vector.extract_strided_slice %122 {offsets = [0, 0], sizes = [4, 16], strides = [1, 1]} : vector<4x32xf32> to vector<4x16xf32>
    %c0_56 = arith.constant 0 : index
    %c0_57 = arith.constant 0 : index
    %124 = vector.load %arg5[%c0_56, %c0_57] : memref<8x16xf32, #tpu.memory_space<vmem>>, vector<4x16xf32>
    tpu.vector_store %arg5[%c0_56, %c0_57], %123 {strides = array<i32>} : memref<8x16xf32, #tpu.memory_space<vmem>>, vector<4x16xf32>,
    %125 = vector.extract_strided_slice %122 {offsets = [0, 16], sizes = [4, 16], strides = [1, 1]} : vector<4x32xf32> to vector<4x16xf32>
    %c4 = arith.constant 4 : index
    %c0_58 = arith.constant 0 : index
    %126 = vector.load %arg5[%c4, %c0_58] : memref<8x16xf32, #tpu.memory_space<vmem>>, vector<4x16xf32>
    tpu.vector_store %arg5[%c4, %c0_58], %125 {strides = array<i32>} : memref<8x16xf32, #tpu.memory_space<vmem>>, vector<4x16xf32>,
    return
  }
}

</mosaic_0001>

<bundles_post_ra>
// kernel: fwd.1
= control target key start
LH: loop header
LB: loop body
LE: loop exit
PB: predicated region body
PF: predicated region fallthrough
CT: control target
= control target key end

     0   :  { %10 = vsyncpa [#allocation3], 0  ;;  %s795_s0 = inlined_call_operand.vmem [shape: f32[2,8,4], index: 0, kind: input, shape index: {}]   ;;  %s796_s1 = inlined_call_operand.vmem [shape: s32[2,8,4], index: 1, kind: input, shape index: {}]   ;;  %s797_s2 = inlined_call_operand.hbm [shape: s32[2,8,8], index: 2, kind: input, shape index: {}]   ;;  %s798_s3 = inlined_call_operand.vmem [shape: f32[48,32], index: 3, kind: input, shape index: {}]   ;;  %s799_s4 = inlined_call_operand.hbm [shape: f32[16,32], index: 4, kind: input, shape index: {}]   ;;  %s800_s5 = inlined_call_operand.hbm [shape: f32[8,16], index: 5, kind: output, shape index: {}]  }
   0x1   :  { %11 = vsyncpa [#allocation6], 0 }
   0x2   :  { %12 = vsyncpa [#allocation4], 0  ;;  %s666_s18 = smov [#allocation2]  }
   0x3   :  { %s22_s19 = sshll.u32 %s666_s18, 4  ;;  %s23_s19 = int_to_ptr.vmem [resolvable:$true] %s22_s19 }
   0x4   :  { %s608_s20 = scalar_lea.vmem %s23_s19, 256  ;;  %p613_p1 = scmp.lt.s32.totalorder %s23_s19, %s23_s19 }
   0x5   :  { %p609_p0 = scmp.ne.s32.totalorder %s23_s19, %s608_s20  ;;  %p614_p2 = scmp.lt.s32.totalorder %s608_s20, %s608_s20 }
   0x7   :  { %p615_p3 = por %p614_p2, %p613_p1 }
   0x9   :  { %p616_p4 = pnand %p615_p3, %p609_p0 }
   0xb   :  { %619 = shalt.err (!%p616_p4)
}
   0xc   :  { %s667_s21 = smov 128   ;;  %s668_s22 = smov 8  }
   0xd   :  { %28 = dma.hbm_to_vmem [thread:$0]  %s797_s2, 256, %s23_s19, [#allocation3], %s667_s21, %s667_s21, %s668_s22  }
   0xe   :  { %s669_s25 = smov [#allocation5]  }
   0xf   :  { %s36_s26 = sshll.u32 %s669_s25, 4  ;;  %s37_s26 = int_to_ptr.vmem [resolvable:$true] %s36_s26 }
  0x10   :  { %s628_s27 = scalar_lea.vmem %s37_s26, 256  ;;  %p633_p6 = scmp.lt.s32.totalorder %s37_s26, %s37_s26 }
  0x11   :  { %p629_p5 = scmp.ne.s32.totalorder %s37_s26, %s628_s27  ;;  %p634_p7 = scmp.lt.s32.totalorder %s628_s27, %s628_s27 }
  0x13   :  { %p635_p8 = por %p634_p7, %p633_p6 }
  0x15   :  { %p636_p9 = pnand %p635_p8, %p629_p5 }
  0x17   :  { %639 = shalt.err (!%p636_p9)
}
  0x18   :  { %42 = dma.hbm_to_vmem [thread:$0]  %s799_s4, 256, %s37_s26, [#allocation6], %s667_s21, %s667_s21, %s668_s22  }
  0x19   :  { %660 = dma.done.wait [#allocation3], 256  }
  0x1a   :  { %661 = vsyncadd [#allocation3], 4294967040 }
  0x1b   :  { %662 = dma.done.wait [#allocation6], 256  }
  0x1c   :  { %663 = vsyncadd [#allocation6], 4294967040  ;;  %v670_v0 = vmov 0.0   ;;  %v506_v1 = vld [vmem:[%s796_s1 + $0x8] sm:$0xff]  ;;  %s671_s6 = smov 4   ;;  %v73_v4 = vld [vmem:[%s798_s3] sm:$0xff]  ;;  %v162_v21 = vlaneseq }
  0x1d   :  { %539 = vmatprep.subr.mxu0 %v670_v0  ;;  %546 = vmatprep.subr.mxu1 %v670_v0  ;;  %v74_v2 = vld [vmem:[%s798_s3 + $0x8] sm:$0xff]  ;;  %vm672_vm0 = vmmov 0   ;;  %vm56_vm1 = vcmask 31744   ;;  %v58_v5 = vld [vmem:[%s796_s1] sm:$0xff]  ;;  %vm69_vm2 = vcmask 64512   ;;  %vm88_vm3 = vcmask 130048  }
  0x1e   :  { %61 = vrot.lane.b32.xlu0 %v506_v1, %s671_s6  ;;  %v505_v3 = vld [vmem:[%s795_s0 + $0x8] sm:$0xff]  ;;  %540 = vmatpush3.msra.mxu0 %v74_v2  ;;  %v49_v9 = vld [vmem:[%s795_s0] sm:$0xff]  ;;  %v673_v17 = vmov 24   ;;  %s674_s0 = smov 1   ;;  %s675_s1 = smov 127   ;;  %v71_v20 = vld [vmem:[#allocation5] sm:$0xff] }
  0x1f   :  { %541 = vmatprep.subr.mxu0 %v670_v0  ;;  %543 = vmatprep.mubr.msk.f32.mxu0 %vm672_vm0, %v670_v0  ;;  %v752_v22 = vand.u32 127, %v162_v21  ;;  %vm174_vm4 = vcmask 121856   ;;  %vm169_vm6 = vcmask 7168   ;;  %vm185_vm8 = vcmask 195584   ;;  %v66_v40 = vld [vmem:[#allocation2 + $0x8] sm:$0xff]  ;;  %v77_v42 = vld [vmem:[%s798_s3 + $0x20] sm:$0xff] }
  0x20   :  { %542 = vmatpush3.msra.mxu0 %v73_v4  ;;  %552 = vmatprep.mubr.msk.f32.mxu1 %vm672_vm0, %v670_v0  ;;  %v676_v28 = vmov 26   ;;  %v677_v34 = vmov 25   ;;  %v78_v41 = vld [vmem:[%s798_s3 + $0x28] sm:$0xff]  ;;  %v76_v43 = vld [vmem:[%s798_s3 + $0x18] sm:$0xff]  ;;  %v64_v48 = vld [vmem:[#allocation2] sm:$0xff]  ;;  %s678_s24 = smov 16  }
  0x21   :  { %555 = vmatprep.subr.mxu0 %v670_v0  ;;  %590 = vset.pattern.permute.xlu1 %v673_v17  ;;  %v164_v23 = vand.u32 7, %v752_v22  ;;  %v75_v50 = vld [vmem:[%s798_s3 + $0x10] sm:$0xff]  ;;  %vm291_vm9 = vcmask 261120   ;;  %v365_v4 = vand.u32 15, %v752_v22  ;;  %vm374_vm10 = vcmask 252928   ;;  %s679_s3 = smov 112  }
  0x22   :  { %53 = vrot.lane.b32.xlu0 %v505_v3, %s671_s6  ;;  %v72_v3 = vld [vmem:[#allocation5 + $0x8] sm:$0xf]  ;;  %vm457_vm13 = vcmask 257024   ;;  %vm482_vm14 = vcmask 125952   ;;  %s680_s25 = smov [#allocation7]  }
  0x23   :  { %vm519_vm5 = vcmp.ne.s32.totalorder %v164_v23, 7  ;;  %vm520_vm7 = vcmp.ne.s32.totalorder %v164_v23, 0  ;;  %591 = vset.pattern.permute.xlu0 %v677_v34  ;;  %vm521_vm11 = vcmp.ne.s32.totalorder %v365_v4, 15  ;;  %vm522_vm12 = vcmp.ne.s32.totalorder %v365_v4, 0  ;;  %s495_s26 = sshll.u32 %s680_s25, 4  ;;  %s496_s26 = int_to_ptr.vmem [resolvable:$true] %s495_s26 }
  0x24   :  { %s640_s27 = scalar_lea.vmem %s496_s26, 128  ;;  %p645_p11 = scmp.lt.s32.totalorder %s496_s26, %s496_s26 }
  0x25   :  { %p641_p10 = scmp.ne.s32.totalorder %s496_s26, %s640_s27  ;;  %p646_p12 = scmp.lt.s32.totalorder %s640_s27, %s640_s27 }
  0x27   :  { %p647_p13 = por %p646_p12, %p645_p11 }
  0x29   :  { %p648_p0 = pnand %p647_p13, %p641_p10 }
  0x90   :  { %v62_v6 = vpop.permute.xlu0 %61 }
  0x91   :  { %v63_v7 = vsel %vm56_vm1, %v58_v5, %v62_v6 }
  0x92   :  { %v79_v8 = vand.u32 1, %v63_v7 }
  0x94   :  { %v80_v10 = vcvt.s32.f32 %v79_v8  ;;  %v54_v11 = vpop.permute.xlu0 %53 }
  0x95   :  { %v57_v12 = vsel %vm56_vm1, %v49_v9, %v54_v11 }
  0x96   :  { %v81_v13 = vmul.f32 %v80_v10, %v57_v12 }
  0x98   :  { %84 = vrot.lane.b32.xlu1 %v81_v13, %s668_s22  ;;  %v82_v14 = vsub.f32 %v57_v12, %v81_v13 }
 0x10a   :  { %v85_v15 = vpop.permute.xlu1 %84 }
 0x10b   :  { %v87_v16 = vsel %vm69_vm2, %v82_v14, %v85_v15 }
 0x10c   :  { %544 = vmatmul.mubr.msk.f32.vlgmr.msra.gmra.mxu0 %vm88_vm3, %v87_v16 }
 0x10d   :  { %563 = vmatprep.mubr.msk.f32.mxu0 %vm672_vm0, %v670_v0  ;;  %556 = vmatpush3.msra.mxu0 %v78_v41 }
 0x10e   :  { %557 = vmatprep.subr.mxu0 %v670_v0 }
 0x10f   :  { %558 = vmatpush3.msra.mxu0 %v77_v42 }
 0x110   :  { %559 = vmatprep.subr.mxu0 %v670_v0 }
 0x111   :  { %560 = vmatpush3.msra.mxu0 %v76_v43 }
 0x112   :  { %561 = vmatprep.subr.mxu0 %v670_v0 }
 0x113   :  { %562 = vmatpush3.msra.mxu0 %v75_v50 }
 0x1cc   :  { %v158_v18 = vpop.f32.mrf.mxu0 }
 0x1cd   :  { %166 = vrot.lane.b32.xlu0 %v158_v18, %s674_s0  ;;  %171 = vrot.lane.b32.xlu1 %v158_v18, %s675_s1 }
 0x1ce   :  { %v545_v19 = vpop.f32.mrf.mxu0 }
 0x1d1   :  { %182 = vperm.xlu1 %590, %v71_v20  }
 0x1d5   :  { %592 = vset.pattern.permute.xlu1 %v676_v28 }
 0x1d6   :  { %277 = vperm.xlu1 %592, %v71_v20  }
 0x1da   :  { %593 = vset.pattern.permute.xlu1 %v673_v17 }
 0x23f   :  { %v172_v24 = vpop.permute.xlu1 %171  ;;  %v167_v26 = vpop.permute.xlu0 %166 }
 0x240   :  { %v175_v25 = vsel %vm174_vm4, %v172_v24, 0.0  ;;  %v170_v27 = vsel %vm169_vm6, 0.0, %v167_v26 }
 0x241   :  { %547 = vmatpush3.msk.msra.mxu1 %vm519_vm5, %v175_v25 }
 0x242   :  { %548 = vmatprep.subr.mxu1 %v670_v0 }
 0x243   :  { %549 = vmatpush3.msra.mxu1 %v158_v18 }
 0x244   :  { %550 = vmatprep.subr.mxu1 %v670_v0 }
 0x245   :  { %551 = vmatpush3.msk.msra.mxu1 %vm520_vm7, %v170_v27 }
 0x246   :  { %553 = vmatmul.mubr.msk.f32.vlgmr.msra.gmra.mxu1 %vm185_vm8, %v71_v20  ;;  %566 = vmatprep.subr.mxu1 %v670_v0 }
 0x247   :  { %572 = vmatprep.mubr.msk.f32.mxu1 %vm672_vm0, %v670_v0 }
 0x24c   :  { %v183_v29 = vpop.permute.xlu1 %182 }
 0x251   :  { %v278_v44 = vpop.permute.xlu1 %277 }
 0x306   :  { %v254_v30 = vpop.f32.mrf.mxu1 }
 0x307   :  { %v255_v31 = vadd.f32 %v254_v30, %v183_v29 }
 0x308   :  { %v554_v32 = vpop.f32.mrf.mxu1 }
 0x309   :  { %v258_v33 = vsel %vm88_vm3, %v255_v31, 0.0 }
 0x30a   :  { %259 = vadd.xlane.f32.xlu0 %v258_v33 }
 0x320   :  { %272 = vperm.xlu0 %591, %v71_v20  }
 0x393   :  { %v260_v35 = vpop.xlane.xlu0 %259 }
 0x394   :  { %v261_v36 = vmul.f32 0.0625, %v260_v35 }
 0x396   :  { %v262_v37 = vsub.f32 %v255_v31, %v261_v36 }
 0x398   :  { %v263_v38 = vmul.f32 %v262_v37, %v262_v37 }
 0x39a   :  { %v264_v39 = vsel %vm88_vm3, %v263_v38, 0.0 }
 0x39b   :  { %265 = vadd.xlane.f32.xlu1 %v264_v39  ;;  %v273_v53 = vpop.permute.xlu0 %272 }
 0x3ac   :  { %67 = vrot.lane.b32.xlu1 %v66_v40, %s668_s22 }
 0x424   :  { %v266_v45 = vpop.xlane.xlu1 %265 }
 0x425   :  { %v267_v46 = vmul.f32 0.0625, %v266_v45 }
 0x427   :  { %v268_v47 = vadd.f32 1e-05, %v267_v46 }
 0x428   :  { %v68_v49 = vpop.permute.xlu1 %67 }
 0x429   :  { %596 = vrsqrt.f32 %v268_v47  ;;  %v70_v51 = vsel %vm69_vm2, %v64_v48, %v68_v49 }
 0x42a   :  { %v282_v55 = vand.u32 1, %v70_v51 }
 0x42c   :  { %v283_v58 = vcvt.s32.f32 %v282_v55 }
 0x436   :  { %v597_v52 = vpop.eup %596 }
 0x437   :  { %v270_v54 = vmul.f32 %v597_v52, %v262_v37 }
 0x439   :  { %v275_v56 = vmul.f32 %v273_v53, %v270_v54 }
 0x43b   :  { %v280_v57 = vadd.f32 %v278_v44, %v275_v56 }
 0x43d   :  { %v281_v59 = vmax.f32 %v280_v57, 0.0 }
 0x43f   :  { %v284_v60 = vmul.f32 %v283_v58, %v281_v59 }
 0x441   :  { %287 = vrot.lane.b32.xlu1 %v284_v60, %s678_s24  ;;  %v285_v61 = vsub.f32 %v281_v59, %v284_v60 }
 0x4b3   :  { %v288_v62 = vpop.permute.xlu1 %287 }
 0x4b4   :  { %v290_v63 = vsel %vm88_vm3, %v285_v61, %v288_v62 }
 0x4b5   :  { %564 = vmatmul.mubr.msk.f32.vlgmr.msra.gmra.mxu0 %vm291_vm9, %v290_v63 }
 0x575   :  { %v361_v1 = vpop.f32.mrf.mxu0 }
 0x576   :  { %371 = vrot.lane.b32.xlu1 %v361_v1, %s675_s1 }
 0x577   :  { %v565_v2 = vpop.f32.mrf.mxu0 }
 0x57a   :  { %367 = vrot.lane.b32.xlu1 %v361_v1, %s674_s0 }
 0x57e   :  { %382 = vperm.xlu1 %593, %v72_v3  }
 0x582   :  { %594 = vset.pattern.permute.xlu1 %v676_v28 }
 0x5e8   :  { %v372_v5 = vpop.permute.xlu1 %371 }
 0x5e9   :  { %v375_v6 = vsel %vm374_vm10, %v372_v5, 0.0 }
 0x5ea   :  { %567 = vmatpush3.msk.msra.mxu1 %vm521_vm11, %v375_v6 }
 0x5eb   :  { %568 = vmatprep.subr.mxu1 %v670_v0 }
 0x5ec   :  { %569 = vmatpush3.msra.mxu1 %v361_v1  ;;  %v368_v7 = vpop.permute.xlu1 %367 }
 0x5ed   :  { %v370_v8 = vsel %vm169_vm6, 0.0, %v368_v7  ;;  %570 = vmatprep.subr.mxu1 %v670_v0 }
 0x5ee   :  { %571 = vmatpush3.msk.msra.mxu1 %vm522_vm12, %v370_v8 }
 0x5ef   :  { %573 = vmatmul.mubr.msk.f32.vlgmr.msra.gmra.mxu1 %vm185_vm8, %v72_v3 }
 0x5f9   :  { %v383_v9 = vpop.permute.xlu1 %382 }
 0x6af   :  { %v453_v10 = vpop.f32.mrf.mxu1 }
 0x6b0   :  { %v454_v11 = vadd.f32 %v453_v10, %v383_v9 }
 0x6b1   :  { %v574_v12 = vpop.f32.mrf.mxu1 }
 0x6b2   :  { %v458_v13 = vsel %vm457_vm13, %v454_v11, 0.0 }
 0x6b3   :  { %459 = vadd.xlane.f32.xlu1 %v458_v13 }
 0x6c4   :  { %477 = vperm.xlu1 %594, %v72_v3  }
 0x73c   :  { %v460_v14 = vpop.xlane.xlu1 %459 }
 0x73d   :  { %v461_v15 = vmul.f32 0.03125, %v460_v14 }
 0x73f   :  { %v462_v16 = vsub.f32 %v454_v11, %v461_v15 }
 0x740   :  { %v478_v24 = vpop.permute.xlu1 %477 }
 0x741   :  { %v463_v17 = vmul.f32 %v462_v16, %v462_v16 }
 0x743   :  { %v464_v18 = vsel %vm457_vm13, %v463_v17, 0.0 }
 0x744   :  { %465 = vadd.xlane.f32.xlu0 %v464_v18 }
 0x75a   :  { %472 = vperm.xlu0 %591, %v72_v3  }
 0x75e   :  { %595 = vset.pattern.permute.xlu0 %v676_v28 }
 0x7cd   :  { %v466_v0 = vpop.xlane.xlu0 %465 }
 0x7ce   :  { %v467_v19 = vmul.f32 0.03125, %v466_v0 }
 0x7d0   :  { %v468_v20 = vadd.f32 1e-05, %v467_v19 }
 0x7d2   :  { %598 = vrsqrt.f32 %v468_v20 }
 0x7d5   :  { %v473_v23 = vpop.permute.xlu0 %472 }
 0x7df   :  { %v599_v21 = vpop.eup %598 }
 0x7e0   :  { %v470_v22 = vmul.f32 %v599_v21, %v462_v16 }
 0x7e2   :  { %v475_v25 = vmul.f32 %v473_v23, %v470_v22 }
 0x7e4   :  { %v480_v26 = vadd.f32 %v478_v24, %v475_v25 }
 0x7e6   :  { %v481_v27 = vmax.f32 %v480_v26, 0.0 }
 0x7e8   :  { %485 = vrot.lane.b32.xlu1 %v481_v27, %s679_s3  ;;  %483 = vst.msk [vmem:[#allocation7] sm:$0xf] %vm482_vm14, %v481_v27 }
 0x85a   :  { %v486_v29 = vpop.permute.xlu1 %485 }
 0x85b   :  { %488 = vst.msk [vmem:[#allocation7 + $0x4] sm:$0xf] %vm482_vm14, %v486_v29 }
 0x85c   :  { %651 = shalt.err (!%p648_p0)
}
 0x85d   :  { %498 = dma.vmem_to_hbm [thread:$0]  %s496_s26, 128, %s800_s5, [#allocation4]  }
 0x85e   :  { %664 = dma.done.wait [#allocation4], 128  }
 0x85f   :  { %665 = vsyncadd [#allocation4], 4294967168 }
 0x860   :  { %502 = vsyncpa [#allocation3], 1 }
 0x861   :  { %503 = vsyncpa [#allocation6], 1 }
 0x862   :  { %504 = vsyncpa [#allocation4], 1 }

</bundles_post_ra>
